<compile_context>
chip_gen: v7x
topology: tpu7x:2x2x1
jax: 0.10.0
libtpu: 0.0.40
codegen_flags: <defaults>
</compile_context>

<pallas_src>
import functools
import math

import jax
import jax.numpy as jnp
from jax import lax
from jax.experimental import pallas as pl
from jax.experimental.pallas import tpu as pltpu


def _round_up(x, m):
    return (x + m - 1) // m * m


def _matching_matrix_kernel(tau_ref, q_ref, t_ref, mask_ref, out_ref, *,
                            inv_sqrt_h, t_valid):
    # tau is a single learned scalar held in SMEM.
    tau = tau_ref[0]
    # 1 / sigmoid(tau) == 1 + exp(-tau); fold in the 1/sqrt(h_dim) similarity scale.
    scale = (1.0 + jnp.exp(-tau)) * inv_sqrt_h

    # Similarity on the MXU, contracting H of both operands directly
    # (t_emb consumed in its native (T, H) layout -- no transpose pass).
    sim = lax.dot_general(
        q_ref[...], t_ref[...],
        dimension_numbers=(((1,), (1,)), ((), ())),
        preferred_element_type=jnp.float32,
    )

    keep = mask_ref[...] != 0                      # int8 -> bool, one compare
    # Masked entries become exactly -1e9 (same as mm*0/sigmoid + (-1e9)*1 in torch).
    logits = jnp.where(keep, sim * scale, -1.0e9)

    t_pad = logits.shape[1]
    if t_pad > t_valid:
        # Lane-padding columns must take zero probability and must not change the
        # normalization of fully-masked rows (which stay uniform over the real T).
        col = lax.broadcasted_iota(jnp.int32, logits.shape, 1)
        logits = jnp.where(col < t_valid, logits, -jnp.inf)

    # Softmax over dim=1 (the T axis), numerically stabilized; epilogue stays f32
    # (v5e VPU/EUP have no bf16 path).
    logits = logits - jnp.max(logits, axis=1, keepdims=True)
    e = jnp.exp(logits)
    denom = jnp.sum(e, axis=1, keepdims=True)
    out_ref[...] = e * pl.reciprocal(denom, approx=False)


def matching_matrix(t_emb, q_emb, mask, tau, *,
                    matmul_dtype=jnp.float32, q_tile=128):
    """t_emb: (T, H), q_emb: (Q, H), mask: (Q, T) bool, tau: (1,) f32 -> (Q, T) f32.

    matmul_dtype=jnp.bfloat16 halves embedding DMA and uses the fast bf16 MXU path
    on v6e/v7x (accumulation and the softmax epilogue remain f32)."""
    T, H = t_emb.shape
    Q, H2 = q_emb.shape
    assert H == H2 and mask.shape == (Q, T)

    # Lane-dense output: pad the softmax axis (last dim of the output) to 128.
    t_pad = _round_up(T, 128)
    q8 = _round_up(Q, 8)
    tq = min(q8, q_tile)                 # Q tile; keeps T fully resident per block
    q_pad = _round_up(q8, tq)
    grid = (q_pad // tq,)

    q_in = q_emb.astype(matmul_dtype)
    t_in = t_emb.astype(matmul_dtype)
    if q_pad != Q:
        q_in = jnp.pad(q_in, ((0, q_pad - Q), (0, 0)))
    if t_pad != T:
        t_in = jnp.pad(t_in, ((0, t_pad - T), (0, 0)))
    mask_i8 = mask.astype(jnp.int8)      # 1 byte/elem mask DMA instead of 4
    if q_pad != Q or t_pad != T:
        mask_i8 = jnp.pad(mask_i8, ((0, q_pad - Q), (0, t_pad - T)))

    kernel = functools.partial(
        _matching_matrix_kernel,
        inv_sqrt_h=1.0 / math.sqrt(H),
        t_valid=T,
    )

    emb_itemsize = jnp.dtype(matmul_dtype).itemsize
    cost = pl.CostEstimate(
        flops=2 * q_pad * t_pad * H,
        transcendentals=q_pad * t_pad + 1,
        bytes_accessed=(q_pad * H + grid[0] * t_pad * H) * emb_itemsize
                       + q_pad * t_pad          # int8 mask in
                       + q_pad * t_pad * 4      # f32 out
                       + 4,                     # tau
    )

    out_padded = pl.pallas_call(
        kernel,
        out_shape=jax.ShapeDtypeStruct((q_pad, t_pad), jnp.float32),
        grid=grid,
        in_specs=[
            pl.BlockSpec(memory_space=pltpu.SMEM),          # tau scalar
            pl.BlockSpec((tq, H), lambda i: (i, 0)),        # q_emb tile
            pl.BlockSpec((t_pad, H), lambda i: (0, 0)),     # t_emb, resident per step
            pl.BlockSpec((tq, t_pad), lambda i: (i, 0)),    # int8 mask tile
        ],
        out_specs=pl.BlockSpec((tq, t_pad), lambda i: (i, 0)),
        compiler_params=pltpu.CompilerParams(
            dimension_semantics=("parallel",),              # shard Q tiles across TCs (v7x)
        ),
        cost_estimate=cost,
    )(tau, q_in, t_in, mask_i8)

    if q_pad != Q or t_pad != T:
        return out_padded[:Q, :T]
    return out_padded


def matching_matrix_ref(t_emb, q_emb, mask, tau):
    """Pure-JAX reference mirroring the PyTorch module."""
    mm = (q_emb @ t_emb.T) / (t_emb.shape[1] ** 0.5)
    mask_f = mask.astype(jnp.float32)
    mm = mm * mask_f / jax.nn.sigmoid(tau[0])
    mm = mm + (-1.0e9) * (1.0 - mask_f)
    return jax.nn.softmax(mm, axis=1)


if __name__ == "__main__":
    key = jax.random.PRNGKey(0)
    k1, k2, k3, k4, k5, k6 = jax.random.split(key, 6)

    # --- small case (module-scale shapes) ------------------------------------
    Q, T, H = 8, 16, 32
    q_emb = jax.random.normal(k1, (Q, H), dtype=jnp.float32)
    t_emb = jax.random.normal(k2, (T, H), dtype=jnp.float32)
    mask = jax.random.uniform(k3, (Q, T)) > 0.3
    mask = mask.at[1, :].set(False)          # exercise a fully-masked row
    tau = jnp.zeros((1,), dtype=jnp.float32)  # nn.init.constant_(tau, 0)

    out = jax.block_until_ready(matching_matrix(t_emb, q_emb, mask, tau))
    ref = matching_matrix_ref(t_emb, q_emb, mask, tau)
    assert out.shape == (Q, T)
    assert jnp.allclose(out, ref, atol=1e-5, rtol=1e-5), "f32 small-case mismatch"

    # --- larger case exercising the Q grid and T lane-padding ----------------
    Q2, T2, H2 = 160, 200, 64
    q2 = jax.random.normal(k4, (Q2, H2), dtype=jnp.float32)
    t2 = jax.random.normal(k5, (T2, H2), dtype=jnp.float32)
    m2 = jax.random.uniform(k6, (Q2, T2)) > 0.5
    out2 = jax.block_until_ready(matching_matrix(t2, q2, m2, tau))
    ref2 = matching_matrix_ref(t2, q2, m2, tau)
    assert out2.shape == (Q2, T2)
    assert jnp.allclose(out2, ref2, atol=1e-4, rtol=1e-4), "f32 grid-case mismatch"

    # --- bf16 MXU-operand path (recommended on v6e/v7x), looser tolerance ----
    out_bf16 = jax.block_until_ready(
        matching_matrix(t_emb, q_emb, mask, tau, matmul_dtype=jnp.bfloat16))
    assert jnp.allclose(out_bf16, ref, atol=2e-2), "bf16 path mismatch"

    print("KERNEL_OK")
</pallas_src>

<mosaic_0001>
module attributes {stable_mosaic.version = 11 : i64} {
  func.func @_matching_matrix_kernel(%arg0: i32, %arg1: memref<1xf32, #tpu.memory_space<smem>>, %arg2: memref<8x32xf32, #tpu.memory_space<vmem>>, %arg3: memref<128x32xf32, #tpu.memory_space<vmem>>, %arg4: memref<8x128xi8, #tpu.memory_space<vmem>>, %arg5: memref<8x128xf32, #tpu.memory_space<vmem>>) attributes {dimension_semantics = [#tpu.dimension_semantics<parallel>], iteration_bounds = array<i64: 1>, scalar_prefetch = 0 : i64, scratch_operands = 0 : i64, tpu.core_type = #tpu.core_type<tc>, window_params = [{transform_indices = @transform_0, window_bounds = array<i64: 1>}, {transform_indices = @transform_1, window_bounds = array<i64: 8, 32>}, {pipeline_mode = #tpu.pipeline_mode<synchronous>, transform_indices = @transform_2, window_bounds = array<i64: 128, 32>}, {transform_indices = @transform_3, window_bounds = array<i64: 8, 128>}, {transform_indices = @transform_4, window_bounds = array<i64: 8, 128>}]} {
    %c0 = arith.constant 0 : index
    %0 = memref.load %arg1[%c0] : memref<1xf32, #tpu.memory_space<smem>>
    %cst = arith.constant 0.000000e+00 : f32
    %1 = arith.subf %cst, %0 : f32
    %2 = math.exp %1 : f32
    %cst_0 = arith.constant 1.000000e+00 : f32
    %3 = arith.addf %cst_0, %2 : f32
    %cst_1 = arith.constant 0.176776692 : f32
    %4 = arith.mulf %3, %cst_1 : f32
    %c0_2 = arith.constant 0 : index
    %c0_3 = arith.constant 0 : index
    %5 = vector.load %arg2[%c0_2, %c0_3] : memref<8x32xf32, #tpu.memory_space<vmem>>, vector<8x32xf32>
    %c0_4 = arith.constant 0 : index
    %c0_5 = arith.constant 0 : index
    %6 = vector.load %arg3[%c0_4, %c0_5] : memref<128x32xf32, #tpu.memory_space<vmem>>, vector<128x32xf32>
    %cst_6 = arith.constant dense<0.000000e+00> : vector<8x128xf32>
    %7 = tpu.matmul %5, %6, %cst_6 {dimension_numbers = #tpu.dot_dimension_numbers<[1], [1], [0], [0], [0, 0, 1, 0], [], []>} : vector<8x32xf32>, vector<128x32xf32>, vector<8x128xf32> -> vector<8x128xf32>
    %c0_7 = arith.constant 0 : index
    %c0_8 = arith.constant 0 : index
    %8 = vector.load %arg4[%c0_7, %c0_8] : memref<8x128xi8, #tpu.memory_space<vmem>>, vector<8x128xi8>
    %c0_i8 = arith.constant 0 : i8
    %9 = vector.broadcast %c0_i8 : i8 to vector<8x128xi8>
    %10 = arith.cmpi ne, %8, %9 : vector<8x128xi8>
    %11 = vector.broadcast %4 : f32 to vector<8x128xf32>
    %12 = arith.mulf %7, %11 : vector<8x128xf32>
    %cst_9 = arith.constant -1.000000e+09 : f32
    %13 = vector.broadcast %cst_9 : f32 to vector<8x128xf32>
    %14 = arith.select %10, %12, %13 : vector<8x128xi1>, vector<8x128xf32>
    %15 = tpu.iota {dimensions = array<i32: 1>} : vector<8x128xi32>
    %c16_i32 = arith.constant 16 : i32
    %16 = vector.broadcast %c16_i32 : i32 to vector<8x128xi32>
    %17 = arith.cmpi slt, %15, %16 : vector<8x128xi32>
    %cst_10 = arith.constant 0xFF800000 : f32
    %18 = vector.broadcast %cst_10 : f32 to vector<8x128xf32>
    %19 = arith.select %17, %14, %18 : vector<8x128xi1>, vector<8x128xf32>
    %cst_11 = arith.constant dense<0xFF800000> : vector<8xf32>
    %20 = vector.multi_reduction <maximumf>, %19, %cst_11 [1] : vector<8x128xf32> to vector<8xf32>
    %21 = vector.shape_cast %20 : vector<8xf32> to vector<8x1xf32>
    %22 = vector.broadcast %21 : vector<8x1xf32> to vector<8x128xf32>
    %23 = arith.subf %19, %22 : vector<8x128xf32>
    %24 = math.exp %23 : vector<8x128xf32>
    %cst_12 = arith.constant dense<0.000000e+00> : vector<8xf32>
    %25 = vector.multi_reduction <add>, %24, %cst_12 [1] : vector<8x128xf32> to vector<8xf32>
    %26 = vector.shape_cast %25 : vector<8xf32> to vector<8x1xf32>
    %27 = tpu.reciprocal %26 : vector<8x1xf32> -> vector<8x1xf32>
    %28 = vector.broadcast %27 : vector<8x1xf32> to vector<8x128xf32>
    %29 = arith.mulf %24, %28 : vector<8x128xf32>
    %c0_13 = arith.constant 0 : index
    %c0_14 = arith.constant 0 : index
    %30 = vector.load %arg5[%c0_13, %c0_14] : memref<8x128xf32, #tpu.memory_space<vmem>>, vector<8x128xf32>
    tpu.vector_store %arg5[%c0_13, %c0_14], %29 {strides = array<i32>} : memref<8x128xf32, #tpu.memory_space<vmem>>, vector<8x128xf32>,
    return
  }
  func.func @transform_0(%arg0: i32) -> i32 {
    %c0_i32 = arith.constant 0 : i32
    %c0_i32_0 = arith.constant 0 : i32
    return %c0_i32 : i32
  }
  func.func @transform_1(%arg0: i32) -> (i32, i32) {
    %c0_i32 = arith.constant 0 : i32
    %c0_i32_0 = arith.constant 0 : i32
    return %arg0, %c0_i32 : i32, i32
  }
  func.func @transform_2(%arg0: i32) -> (i32, i32) {
    %c0_i32 = arith.constant 0 : i32
    %c0_i32_0 = arith.constant 0 : i32
    %c0_i32_1 = arith.constant 0 : i32
    return %c0_i32, %c0_i32_0 : i32, i32
  }
  func.func @transform_3(%arg0: i32) -> (i32, i32) {
    %c0_i32 = arith.constant 0 : i32
    %c0_i32_0 = arith.constant 0 : i32
    return %arg0, %c0_i32 : i32, i32
  }
  func.func @transform_4(%arg0: i32) -> (i32, i32) {
    %c0_i32 = arith.constant 0 : i32
    %c0_i32_0 = arith.constant 0 : i32
    return %arg0, %c0_i32 : i32, i32
  }
}

</mosaic_0001>

<bundles_post_ra>
// kernel: tpu_custom_call.1
= control target key start
LH: loop header
LB: loop body
LE: loop exit
PB: predicated region body
PF: predicated region fallthrough
CT: control target
= control target key end

     0   :  { %vm46_vm0 = vcmask 261120   ;;  %v342_v2 = vmov 0.0|0.0   ;;  %vm343_vm2 = vmmov 0   ;;  %v344_v5 = vmov 0.0   ;;  %s464_s0 = inlined_call_operand.<no memory space> [shape: f32[1], index: 0, kind: input, shape index: {}]   ;;  %s465_s1 = inlined_call_operand.vmem [shape: f32[8,32], index: 1, kind: input, shape index: {}]   ;;  %s466_s2 = inlined_call_operand.vmem [shape: f32[128,32], index: 2, kind: input, shape index: {}]   ;;  %s467_s3 = inlined_call_operand.vmem [shape: s8[8,128], index: 3, kind: input, shape index: {}]   ;;  %s468_s4 = inlined_call_operand.hbm [shape: f32[8,128], index: 4, kind: output, shape index: {}]  }
   0x1   :  { %v30_v0 = vld [vmem:[%s466_s2] sm:$0xff]  ;;  %v31_v1 = vld [vmem:[%s466_s2 + $0x8] sm:$0xff]  ;;  %273 = vmatprep.subr.bf16.mxu0 %v342_v2  ;;  %vm380_vm1 = vmpackc.low %vm46_vm0, %vm46_vm0  ;;  %s22_s21 = ssub.f32 0.0, %s464_s0  ;;  %270 = vmatprep.mubr.msk.f32.mxu0 %vm343_vm2, %v344_v5 }
   0x2   :  { %v274_v3 = vpack.c.bf16 %v31_v1, %v30_v0  ;;  %v32_v7 = vld [vmem:[%s466_s2 + $0x10] sm:$0xff]  ;;  %v33_v8 = vld [vmem:[%s466_s2 + $0x18] sm:$0xff] }
   0x3   :  { %v23_v6 = vstv %s22_s21 }
   0x4   :  { %276 = vmatpush3.bf16.xpose.msk.msra.mxu0 %vm380_vm1, %v274_v3  ;;  %v24_v9 = vmul.f32 1.442695, %v23_v6 }
   0x5   :  { %277 = vmatprep.subr.bf16.mxu0 %v342_v2 }
   0x6   :  { %312 = vpow2.f32 %v24_v9 }
   0x7   :  { %10 = vsyncpa [#allocation4], 0  ;;  %v278_v10 = vpack.c.bf16 %v33_v8, %v32_v7  ;;  %v34_v11 = vld [vmem:[%s466_s2 + $0x20] sm:$0xff]  ;;  %v35_v12 = vld [vmem:[%s466_s2 + $0x28] sm:$0xff]  ;;  %v345_v32 = vmov 0   ;;  %v176_v34 = vlaneseq }
   0x8   :  { %v282_v13 = vpack.c.bf16 %v35_v12, %v34_v11  ;;  %v36_v15 = vld [vmem:[%s466_s2 + $0x30] sm:$0xff]  ;;  %v37_v16 = vld [vmem:[%s466_s2 + $0x38] sm:$0xff]  ;;  %v38_v18 = vld [vmem:[%s466_s2 + $0x40] sm:$0xff] }
   0x9   :  { %v286_v17 = vpack.c.bf16 %v37_v16, %v36_v15  ;;  %v39_v19 = vld [vmem:[%s466_s2 + $0x48] sm:$0xff]  ;;  %v40_v21 = vld [vmem:[%s466_s2 + $0x50] sm:$0xff]  ;;  %v41_v22 = vld [vmem:[%s466_s2 + $0x58] sm:$0xff]  ;;  %v177_v36 = vand.u32 127, %v176_v34 }
   0xa   :  { %v290_v20 = vpack.c.bf16 %v39_v19, %v38_v18  ;;  %v294_v23 = vpack.c.bf16 %v41_v22, %v40_v21  ;;  %v42_v24 = vld [vmem:[%s466_s2 + $0x60] sm:$0xff]  ;;  %v43_v25 = vld [vmem:[%s466_s2 + $0x68] sm:$0xff]  ;;  %v44_v27 = vld [vmem:[%s466_s2 + $0x70] sm:$0xff] }
   0xb   :  { %v298_v26 = vpack.c.bf16 %v43_v25, %v42_v24  ;;  %v45_v28 = vld [vmem:[%s466_s2 + $0x78] sm:$0xff]  ;;  %v29_v30 = vld [vmem:[%s465_s1] sm:$0xff]  ;;  %vm178_vm5 = vcmp.lt.s32.totalorder %v177_v36, 16  ;;  %s346_s1 = smov [#allocation3]  }
   0xc   :  { %280 = vmatpush3.bf16.xpose.msk.msra.mxu0 %vm380_vm1, %v278_v10  ;;  %v302_v29 = vpack.c.bf16 %v45_v28, %v44_v27  ;;  %v168_v31 = vld [vmem:[%s467_s3] sm:$0x3]  ;;  %s196_s3 = sshll.u32 %s346_s1, 4  ;;  %s197_s3 = int_to_ptr.vmem [resolvable:$true] %s196_s3 }
   0xd   :  { %281 = vmatprep.subr.bf16.mxu0 %v342_v2  ;;  %vm169_vm3 = vnez %v168_v31  ;;  %s318_s28 = scalar_lea.vmem %s197_s3, 128  ;;  %p323_p1 = scmp.lt.s32.totalorder %s197_s3, %s197_s3 }
   0xe   :  { %v172_v33 = vsel %vm169_vm3, 16843009, %v345_v32  ;;  %p319_p0 = scmp.ne.s32.totalorder %s197_s3, %s318_s28  ;;  %p324_p2 = scmp.lt.s32.totalorder %s318_s28, %s318_s28 }
   0xf   :  { %v173_v35 = vunpack.c.0.s8 %v172_v33 }
  0x10   :  { %v313_v14 = vpop.eup %312  ;;  %p325_p3 = por %p324_p2, %p323_p1 }
  0x11   :  { %305 = vpush %v313_v14  ;;  %vm174_vm4 = vcmp.ne.s32.totalorder %v173_v35, 0 }
  0x12   :  { %p326_p4 = pnand %p325_p3, %p319_p0 }
  0x14   :  { %284 = vmatpush3.bf16.xpose.msk.msra.mxu0 %vm380_vm1, %v282_v13 }
  0x15   :  { %285 = vmatprep.subr.bf16.mxu0 %v342_v2 }
  0x1c   :  { %288 = vmatpush3.bf16.xpose.msk.msra.mxu0 %vm380_vm1, %v286_v17 }
  0x1d   :  { %289 = vmatprep.subr.bf16.mxu0 %v342_v2 }
  0x24   :  { %292 = vmatpush3.bf16.xpose.msk.msra.mxu0 %vm380_vm1, %v290_v20 }
  0x25   :  { %293 = vmatprep.subr.bf16.mxu0 %v342_v2 }
  0x2c   :  { %296 = vmatpush3.bf16.xpose.msk.msra.mxu0 %vm380_vm1, %v294_v23 }
  0x2d   :  { %297 = vmatprep.subr.bf16.mxu0 %v342_v2 }
  0x34   :  { %300 = vmatpush3.bf16.xpose.msk.msra.mxu0 %vm380_vm1, %v298_v26 }
  0x35   :  { %301 = vmatprep.subr.bf16.mxu0 %v342_v2 }
  0x3c   :  { %304 = vmatpush3.bf16.xpose.msk.msra.mxu0 %vm380_vm1, %v302_v29 }
  0x42   :  { %s306_s25 = spop %305 }
  0x43   :  { %271 = vmatmul.mubr.msk.f32.vlgmr.msra.gmra.mrb[0].mxu0 %vm46_vm0, %v29_v30  ;;  %s27_s27 = sadd.f32 1.0, %s306_s25 }
  0x45   :  { %s28_s2 = smul.f32 0.17677669, %s27_s27 }
  0x47   :  { %v170_v37 = vstv %s28_s2 }
 0x116   :  { %v164_v38 = vpop.f32.mrb[0].mxu0 }
 0x117   :  { %v171_v39 = vmul.f32 %v170_v37, %v164_v38  ;;  %v272_v40 = vpop.f32.mrb[1].mxu0 }
 0x119   :  { %v175_v41 = vsel %vm174_vm4, %v171_v39, -1e+09 }
 0x11a   :  { %v179_v42 = vsel %vm178_vm5, %v175_v41, -inf }
 0x11b   :  { %180 = vmax.xlane.f32.xlu0 %v179_v42 }
 0x1a8   :  { %v181_v43 = vpop.xlane.xlu0 %180 }
 0x1a9   :  { %v182_v44 = vsub.f32 %v179_v42, %v181_v43 }
 0x1ab   :  { %v183_v45 = vmul.f32 1.442695, %v182_v44 }
 0x1ad   :  { %314 = vpow2.f32 %v183_v45 }
 0x1b7   :  { %v315_v46 = vpop.eup %314 }
 0x1b8   :  { %185 = vadd.xlane.f32.xlu0 %v315_v46 }
 0x245   :  { %v186_v47 = vpop.xlane.xlu0 %185 }
 0x246   :  { %316 = vrcp.f32 %v186_v47 }
 0x250   :  { %v317_v48 = vpop.eup %316 }
 0x251   :  { %v188_v49 = vmul.f32 %v317_v48, %v315_v46 }
 0x253   :  { %189 = vst [vmem:[#allocation3] sm:$0xff] %v188_v49 }
 0x254   :  { %329 = shalt.err (!%p326_p4)
}
 0x255   :  { %s330_s5 = scalar_lea.hbm %s468_s4, 128 }
 0x256   :  { %p331_p5 = scmp.ne.s32.totalorder %s468_s4, %s330_s5  ;;  %p334_p6 = scmp.lt.u32.totalorder %s330_s5, %s468_s4 }
 0x258   :  { %p336_p7 = pnand %p334_p6, %p331_p5 }
 0x25a   :  { %339 = shalt.err (!%p336_p7)
}
 0x25b   :  { %199 = dma.vmem_to_hbm [thread:$0]  %s197_s3, 128, %s468_s4, [#allocation4]  }
 0x25c   :  { %340 = dma.done.wait [#allocation4], 128  }
 0x25d   :  { %341 = vsyncadd [#allocation4], 4294967168 }
 0x25e   :  { %203 = vsyncpa [#allocation4], 1 }

</bundles_post_ra>
